<compile_context>
chip_gen: v7x
topology: tpu7x:2x2x1
jax: 0.10.0
libtpu: 0.0.40
codegen_flags: <defaults>
</compile_context>

<pallas_src>
import jax
import jax.numpy as jnp
from jax.experimental import pallas as pl
from jax.experimental.pallas import tpu as pltpu


def _pick_hw_tile(hw, max_tile=4096):
    """Largest lane-dense H*W tile: full extent if small / non-128-divisible,
    otherwise the biggest multiple of 128 (<= max_tile) that divides hw."""
    if hw <= max_tile or hw % 128 != 0:
        return hw                      # full-extent block is always legal
    t = max_tile
    while t >= 128:
        if hw % t == 0:
            return t
        t -= 128
    return hw


def _outconv_kernel(w_ref, x_ref, o_ref):
    # (Cout, Cin) @ (Cin, THW) -> (Cout, THW); bf16 operands, f32 accumulation.
    o_ref[...] = jnp.dot(w_ref[...], x_ref[...],
                         preferred_element_type=jnp.float32).astype(o_ref.dtype)


def out_conv(x_nchw, w):
    """OutConv.forward: 1x1 conv, no bias.  x: (N, Cin, H, W) NCHW, w: (Cout, Cin, 1, 1)."""
    n, cin, h, wd = x_nchw.shape
    cout = w.shape[0]
    hw = h * wd

    # Reshape (free, contiguous) and cast operands to bf16 for the MXU.
    x3 = x_nchw.reshape(n, cin, hw).astype(jnp.bfloat16)
    wm = w.reshape(cout, cin).astype(jnp.bfloat16)

    thw = _pick_hw_tile(hw)            # divides hw exactly -> no masked edge blocks
    grid = (n, hw // thw)

    out = pl.pallas_call(
        _outconv_kernel,
        out_shape=jax.ShapeDtypeStruct((n, cout, hw), jnp.float32),
        grid_spec=pltpu.PrefetchScalarGridSpec(
            num_scalar_prefetch=0,
            grid=grid,
            in_specs=[
                # Weights: single full-extent (Cout, Cin) block, VMEM-resident.
                pl.BlockSpec((cout, cin), lambda b, t: (0, 0)),
                # Activations: batch dim squeezed, single K block, HW tiled on lanes.
                pl.BlockSpec((None, cin, thw), lambda b, t: (b, 0, t)),
            ],
            out_specs=pl.BlockSpec((None, cout, thw), lambda b, t: (b, 0, t)),
        ),
        compiler_params=pltpu.CompilerParams(
            dimension_semantics=("parallel", "parallel")),
    )(wm, x3)
    return out.reshape(n, cout, h, wd)


if __name__ == "__main__":
    # Small shapes consistent with the module: batch=2, in_channels=4, 16x16 spatial.
    N, Cin, H, W = 2, 4, 16, 16
    Cout = 3

    root = jax.random.PRNGKey(0)
    kx, kw = jax.random.split(root)
    x = jax.random.normal(kx, (N, Cin, H, W), jnp.float32)          # NCHW like PyTorch
    w = jax.random.normal(kw, (Cout, Cin, 1, 1), jnp.float32) * (1.0 / jnp.sqrt(Cin))

    fwd = jax.jit(out_conv)
    y = jax.block_until_ready(fwd(x, w))

    assert y.shape == (N, Cout, H, W), y.shape
    assert jnp.all(jnp.isfinite(y))

    # Reference check (f32 einsum); bf16-input / f32-accumulate stays close.
    ref = jnp.einsum("nchw,oc->nohw", x, w.reshape(Cout, Cin))
    err = float(jnp.max(jnp.abs(y - ref)))
    assert err < 0.12, err

    print("KERNEL_OK")
</pallas_src>

<mosaic_0001>
module attributes {stable_mosaic.version = 11 : i64} {
  func.func @_outconv_kernel(%arg0: i32, %arg1: i32, %arg2: memref<3x4xbf16, #tpu.memory_space<vmem>>, %arg3: memref<1x4x256xbf16, #tpu.memory_space<vmem>>, %arg4: memref<1x3x256xf32, #tpu.memory_space<vmem>>) attributes {dimension_semantics = [#tpu.dimension_semantics<parallel>, #tpu.dimension_semantics<parallel>], iteration_bounds = array<i64: 2, 1>, scalar_prefetch = 0 : i64, scratch_operands = 0 : i64, tpu.core_type = #tpu.core_type<tc>, window_params = [{pipeline_mode = #tpu.pipeline_mode<synchronous>, transform_indices = @transform_0, window_bounds = array<i64: 3, 4>}, {transform_indices = @transform_1, window_bounds = array<i64: 1, 4, 256>}, {transform_indices = @transform_2, window_bounds = array<i64: 1, 3, 256>}]} {
    %c0 = arith.constant 0 : index
    %c0_0 = arith.constant 0 : index
    %0 = vector.load %arg2[%c0, %c0_0] : memref<3x4xbf16, #tpu.memory_space<vmem>>, vector<3x4xbf16>
    %c0_1 = arith.constant 0 : index
    %c0_2 = arith.constant 0 : index
    %c0_3 = arith.constant 0 : index
    %1 = vector.load %arg3[%c0_1, %c0_2, %c0_3] : memref<1x4x256xbf16, #tpu.memory_space<vmem>>, vector<1x4x256xbf16>
    %2 = vector.shape_cast %1 : vector<1x4x256xbf16> to vector<4x256xbf16>
    %cst = arith.constant dense<0.000000e+00> : vector<3x256xf32>
    %3 = tpu.matmul %0, %2, %cst {dimension_numbers = #tpu.dot_dimension_numbers<[1], [0], [0], [1], [0, 0, 1, 1], [], []>} : vector<3x4xbf16>, vector<4x256xbf16>, vector<3x256xf32> -> vector<3x256xf32>
    %c0_4 = arith.constant 0 : index
    %c0_5 = arith.constant 0 : index
    %c0_6 = arith.constant 0 : index
    %4 = vector.load %arg4[%c0_4, %c0_5, %c0_6] : memref<1x3x256xf32, #tpu.memory_space<vmem>>, vector<1x3x256xf32>
    %5 = vector.shape_cast %4 : vector<1x3x256xf32> to vector<3x256xf32>
    %6 = vector.shape_cast %3 : vector<3x256xf32> to vector<1x3x256xf32>
    tpu.vector_store %arg4[%c0_4, %c0_5, %c0_6], %6 {strides = array<i32>} : memref<1x3x256xf32, #tpu.memory_space<vmem>>, vector<1x3x256xf32>,
    return
  }
  func.func @transform_0(%arg0: i32, %arg1: i32) -> (i32, i32) {
    %c0_i32 = arith.constant 0 : i32
    %c0_i32_0 = arith.constant 0 : i32
    %c0_i32_1 = arith.constant 0 : i32
    return %c0_i32, %c0_i32_0 : i32, i32
  }
  func.func @transform_1(%arg0: i32, %arg1: i32) -> (i32, i32, i32) {
    %c0_i32 = arith.constant 0 : i32
    %c0_i32_0 = arith.constant 0 : i32
    return %arg0, %c0_i32, %arg1 : i32, i32, i32
  }
  func.func @transform_2(%arg0: i32, %arg1: i32) -> (i32, i32, i32) {
    %c0_i32 = arith.constant 0 : i32
    %c0_i32_0 = arith.constant 0 : i32
    return %arg0, %c0_i32, %arg1 : i32, i32, i32
  }
}

</mosaic_0001>

<bundles_post_ra>
// kernel: out_conv.1
= control target key start
LH: loop header
LB: loop body
LE: loop exit
PB: predicated region body
PF: predicated region fallthrough
CT: control target
= control target key end

     0   :  { %s420_s9 = smov 0   ;;  %s422_s10 = smov 0   ;;  %s456_s0 = inlined_call_operand.vmem [shape: bf16[3,4], index: 0, kind: input, shape index: {}]   ;;  %s457_s1 = inlined_call_operand.vmem [shape: bf16[2,4,256], index: 1, kind: input, shape index: {}]   ;;  %s458_s2 = inlined_call_operand.vmem [shape: f32[2,3,256], index: 2, kind: output, shape index: {}]  }
   0x1   :  { %s424_s11 = smov 0  }
   0x2 LB: > { %s24_s12 = sadd.s32 1, %s398_s10  ;;  %p343_p0 = scmp.ge.s32.totalorder %s402_s11, 1  ;;  %s402_s11 = sphi %s424_s11, %s12_s11   ;;  %s398_s10 = sphi %s422_s10, %s460_s10   ;;  %s394_s9 = sphi %s420_s9, %s459_s9  }
   0x3   : > { %p26_p1 = scmp.ge.s32.totalorder %s24_s12, 2  ;;  %p133_p2 = scmp.lt.s32.totalorder %s402_s11, 3 }
   0x5   : > { %s462_s12 = smov (%p26_p1, %s24_s12), 0  ;;  %p134_p3 = pnand %p343_p0, %p133_p2 }
   0x6   : > { %p164_p4 = scmp.lt.s32.totalorder (!%p134_p3), %s394_s9, 1  ;;  %v404_v0 = vmov (!%p134_p3), 0   ;;  %vm199_vm0 = vcmask (!%p134_p3), 1041408   ;;  %v184_v4 = vld [vmem:[%s456_s0] sm:$0x3] (!%p134_p3)  ;;  %vm195_vm1 = vcmask (!%p134_p3), 31744  }
   0x7   : > { %137 = sbr.rel (%p134_p3) target bundleno = 240 (0xf0), region = 28  ;;  %238 = vmatprep.mubr.bf16.mxu0 (!%p134_p3), %v404_v0 }
   0xe   : > { %s464_s9 = smov (!%p164_p4, %s394_s9), 1 }
   0xf   : > { %s353_s13 = sshll.u32 %s464_s9, 2  ;;  %s354_s19 = sshll.u32 %s464_s9, 3 }
  0x10   : > { %s171_s16 = scalar_lea.vmem %s457_s1, %s353_s13  ;;  %s181_s22 = scalar_lea.vmem %s458_s2, %s354_s19 }
  0x11   : > { %v348_v1 = vld.sshfl [vmem:[%s171_s16] sm:$0x33 pattern:$0x76325410] }
  0x12   : > { %v194_v2 = vcombine.high %v348_v1, %v348_v1  ;;  %v201_v3 = vsel %vm199_vm0, %v348_v1, 0 }
  0x14   : > { %349 = vmatprep.subr.msk.bf16.mxu0 %vm199_vm0, %v194_v2 }
  0x15   : > { %207 = vmatpush1.bf16.msra.mxu0 %v201_v3 }
  0x18   : > { %350 = vmatmul.mubr.msk.bf16.vlgmr.msra.gmra.mrb[0].mxu0 %vm195_vm1, %v184_v4 }
  0xeb   : > { %v240_v5 = vpop.f32.mrb[0].mxu0 }
  0xec   : > { %v242_v6 = vpop.f32.mrb[1].mxu0 }
  0xed   : > { %v249_v7 = vcombine.low %v240_v5, %v242_v6  ;;  %v244_v8 = vpop.f32.mrb[2].mxu0 }
  0xee   : > { %v245_v9 = vpop.f32.mrb[3].mxu0 }
  0xef   : > { %251 = vst [vmem:[%s181_s22] sm:$0x77] %v249_v7 }
  0xf0 PF: > { %s12_s11 = sadd.s32 1, %s402_s11   ;;  %s459_s9 = smov %s398_s10 }
  0xf1   : > { %p9_p5 = scmp.ge.s32.totalorder %s12_s11, 4   ;;  %s460_s10 = smov %s462_s12 }
  0xf3   :  { %11 = sbr.rel (!%p9_p5) target bundleno = 2 (0x2), region = 58 }

</bundles_post_ra>
